<compile_context>
chip_gen: v7x
topology: tpu7x:2x2x1
jax: 0.10.0
libtpu: 0.0.40
codegen_flags: <defaults>
</compile_context>

<pallas_src>
import jax
import jax.numpy as jnp
from jax import lax
from jax.experimental import pallas as pl
from jax.experimental.pallas import tpu as pltpu


def _fused_minibatch_kernel(x_ref, t_ref, s_ref, out_ref, m_ref):
    """x_ref: (N, A) full; t_ref: (A, B*C); s_ref: (B*C, B); out_ref: (TI, B);
    m_ref: VMEM scratch (N, B*C)."""
    N = x_ref.shape[0]
    TI, B = out_ref.shape

    # MXU: full M = x @ T_flat into VMEM scratch, lane-dense (N, B*C).
    m_ref[...] = jnp.dot(
        x_ref[...], t_ref[...], preferred_element_type=jnp.float32
    )

    # Rows of M owned by this grid step.
    start = pl.program_id(0) * TI
    if TI % 8 == 0:
        start = pl.multiple_of(start, 8)
    m_i = m_ref[pl.ds(start, TI), :]          # (TI, B*C)
    s_mat = s_ref[...]                        # (B*C, B) block-diagonal ones

    def body(j, acc):
        m_j = m_ref[pl.ds(j, 1), :]           # (1, B*C) row j, broadcast below
        diff = jnp.abs(m_i - m_j)             # (TI, B*C) VPU, lane-dense
        # Grouped sum over C on the MXU: d[i, b] = sum_c |M_i - M_j|[b*C + c]
        d = jnp.dot(diff, s_mat, preferred_element_type=jnp.float32)  # (TI, B)
        return acc + jnp.exp(-d)              # EUP

    acc0 = jnp.zeros((TI, B), jnp.float32)
    acc = lax.fori_loop(0, N, body, acc0, unroll=(N <= 32))

    out_ref[...] = acc - 1.0                  # remove exact self term exp(0)=1


def _pick_row_tile(n, cap=256):
    """Largest i-row tile: full N if it fits, else a divisor that is a
    multiple of 8 (keeps BlockSpec (8,128)-legal)."""
    if n <= cap:
        return n
    for t in range(cap, 7, -1):
        if n % t == 0 and t % 8 == 0:
            return t
    return n


def minibatch_discrimination(x, T):
    """x: (N, A) float32, T: (A, B, C) float32 -> (N, A+B) float32."""
    N, A = x.shape
    A2, B, C = T.shape
    assert A == A2
    t_flat = T.reshape(A, B * C)

    # Constant block-diagonal summation matrix: S[b*C + c, b] = 1.
    s_mat = (
        jnp.arange(B * C)[:, None] // C == jnp.arange(B)[None, :]
    ).astype(jnp.float32)

    TI = _pick_row_tile(N)
    grid = (N // TI,)

    out = pl.pallas_call(
        _fused_minibatch_kernel,
        out_shape=jax.ShapeDtypeStruct((N, B), jnp.float32),
        grid_spec=pltpu.PrefetchScalarGridSpec(
            num_scalar_prefetch=0,
            grid=grid,
            in_specs=[
                pl.BlockSpec((N, A), lambda i: (0, 0)),        # x (full, resident)
                pl.BlockSpec((A, B * C), lambda i: (0, 0)),    # T_flat (resident)
                pl.BlockSpec((B * C, B), lambda i: (0, 0)),    # S (resident)
            ],
            out_specs=pl.BlockSpec((TI, B), lambda i: (i, 0)),
            scratch_shapes=[pltpu.VMEM((N, B * C), jnp.float32)],
        ),
        compiler_params=pltpu.CompilerParams(
            dimension_semantics=("parallel",),
            vmem_limit_bytes=32 * 1024 * 1024,
        ),
    )(x, t_flat, s_mat)

    # glue concat, equivalent to torch.cat([x, out], 1)
    # TODO(synk): could be written in-kernel as a (TI, A+B) output block to
    # save one small XLA copy; kept in the wrapper for layout robustness.
    return jnp.concatenate([x, out], axis=1)


def _reference(x, T):
    A, B, C = T.shape
    M = x @ T.reshape(A, B * C)
    M = M.reshape(-1, B, C)[None]                 # (1, N, B, C)
    M_t = jnp.transpose(M, (1, 0, 2, 3))          # (N, 1, B, C)
    out = jnp.sum(jnp.exp(-jnp.abs(M - M_t).sum(3)), axis=0) - 1.0
    return jnp.concatenate([x, out], axis=1)


if __name__ == "__main__":
    # small, module-consistent shapes
    N = 8                 # batch
    input_features = 32   # A
    output_features = 16  # B
    hidden_features = 16  # C (module default)

    key = jax.random.PRNGKey(0)
    kx, kt = jax.random.split(key)
    x = jax.random.normal(kx, (N, input_features), dtype=jnp.float32)
    # T ~ randn(A, B, C); minibatch_normal_init=True just re-draws N(0,1).
    T = jax.random.normal(
        kt, (input_features, output_features, hidden_features), dtype=jnp.float32
    )

    y = minibatch_discrimination(x, T)
    y = jax.block_until_ready(y)

    y_ref = _reference(x, T)
    assert y.shape == (N, input_features + output_features)
    assert jnp.allclose(y, y_ref, atol=1e-4, rtol=1e-4)

    print("KERNEL_OK")
</pallas_src>

<mosaic_0001>
module attributes {stable_mosaic.version = 11 : i64} {
  func.func @_fused_minibatch_kernel(%arg0: i32, %arg1: memref<8x32xf32, #tpu.memory_space<vmem>>, %arg2: memref<32x256xf32, #tpu.memory_space<vmem>>, %arg3: memref<256x16xf32, #tpu.memory_space<vmem>>, %arg4: memref<8x16xf32, #tpu.memory_space<vmem>>, %arg5: memref<8x256xf32, #tpu.memory_space<vmem>>) attributes {dimension_semantics = [#tpu.dimension_semantics<parallel>], iteration_bounds = array<i64: 1>, scalar_prefetch = 0 : i64, scratch_operands = 1 : i64, tpu.core_type = #tpu.core_type<tc>, window_params = [{pipeline_mode = #tpu.pipeline_mode<synchronous>, transform_indices = @transform_0, window_bounds = array<i64: 8, 32>}, {pipeline_mode = #tpu.pipeline_mode<synchronous>, transform_indices = @transform_1, window_bounds = array<i64: 32, 256>}, {pipeline_mode = #tpu.pipeline_mode<synchronous>, transform_indices = @transform_2, window_bounds = array<i64: 256, 16>}, {transform_indices = @transform_3, window_bounds = array<i64: 8, 16>}]} {
    %c0 = arith.constant 0 : index
    %c0_0 = arith.constant 0 : index
    %0 = vector.load %arg1[%c0, %c0_0] : memref<8x32xf32, #tpu.memory_space<vmem>>, vector<8x32xf32>
    %c0_1 = arith.constant 0 : index
    %c0_2 = arith.constant 0 : index
    %1 = vector.load %arg2[%c0_1, %c0_2] : memref<32x256xf32, #tpu.memory_space<vmem>>, vector<32x256xf32>
    %cst = arith.constant dense<0.000000e+00> : vector<8x256xf32>
    %2 = tpu.matmul %0, %1, %cst {dimension_numbers = #tpu.dot_dimension_numbers<[1], [0], [0], [1], [0, 0, 1, 1], [], []>} : vector<8x32xf32>, vector<32x256xf32>, vector<8x256xf32> -> vector<8x256xf32>
    %c0_3 = arith.constant 0 : index
    %c0_4 = arith.constant 0 : index
    %3 = vector.load %arg5[%c0_3, %c0_4] : memref<8x256xf32, #tpu.memory_space<vmem>>, vector<8x256xf32>
    tpu.vector_store %arg5[%c0_3, %c0_4], %2 {strides = array<i32>} : memref<8x256xf32, #tpu.memory_space<vmem>>, vector<8x256xf32>,
    %c8_i32 = arith.constant 8 : i32
    %4 = arith.muli %arg0, %c8_i32 : i32
    %5 = tpu.assume_multiple %4, 8 : i32
    %6 = arith.index_cast %5 : i32 to index
    %c0_5 = arith.constant 0 : index
    %7 = vector.load %arg5[%6, %c0_5] : memref<8x256xf32, #tpu.memory_space<vmem>>, vector<8x256xf32>
    %c0_6 = arith.constant 0 : index
    %c0_7 = arith.constant 0 : index
    %8 = vector.load %arg3[%c0_6, %c0_7] : memref<256x16xf32, #tpu.memory_space<vmem>>, vector<256x16xf32>
    %cst_8 = arith.constant 0.000000e+00 : f32
    %9 = vector.broadcast %cst_8 : f32 to vector<8x16xf32>
    %c0_i32 = arith.constant 0 : i32
    %10 = arith.index_cast %c0_i32 : i32 to index
    %c0_9 = arith.constant 0 : index
    %11 = vector.load %arg5[%10, %c0_9] : memref<8x256xf32, #tpu.memory_space<vmem>>, vector<1x256xf32>
    %12 = vector.broadcast %11 : vector<1x256xf32> to vector<8x256xf32>
    %13 = arith.subf %7, %12 : vector<8x256xf32>
    %14 = math.absf %13 : vector<8x256xf32>
    %cst_10 = arith.constant dense<0.000000e+00> : vector<8x16xf32>
    %15 = tpu.matmul %14, %8, %cst_10 {dimension_numbers = #tpu.dot_dimension_numbers<[1], [0], [0], [1], [0, 0, 1, 1], [], []>} : vector<8x256xf32>, vector<256x16xf32>, vector<8x16xf32> -> vector<8x16xf32>
    %cst_11 = arith.constant 0.000000e+00 : f32
    %16 = vector.broadcast %cst_11 : f32 to vector<8x16xf32>
    %17 = arith.subf %16, %15 : vector<8x16xf32>
    %18 = math.exp %17 : vector<8x16xf32>
    %19 = arith.addf %9, %18 : vector<8x16xf32>
    %c1_i32 = arith.constant 1 : i32
    %20 = arith.index_cast %c1_i32 : i32 to index
    %c0_12 = arith.constant 0 : index
    %21 = vector.load %arg5[%20, %c0_12] : memref<8x256xf32, #tpu.memory_space<vmem>>, vector<1x256xf32>
    %22 = vector.broadcast %21 : vector<1x256xf32> to vector<8x256xf32>
    %23 = arith.subf %7, %22 : vector<8x256xf32>
    %24 = math.absf %23 : vector<8x256xf32>
    %cst_13 = arith.constant dense<0.000000e+00> : vector<8x16xf32>
    %25 = tpu.matmul %24, %8, %cst_13 {dimension_numbers = #tpu.dot_dimension_numbers<[1], [0], [0], [1], [0, 0, 1, 1], [], []>} : vector<8x256xf32>, vector<256x16xf32>, vector<8x16xf32> -> vector<8x16xf32>
    %cst_14 = arith.constant 0.000000e+00 : f32
    %26 = vector.broadcast %cst_14 : f32 to vector<8x16xf32>
    %27 = arith.subf %26, %25 : vector<8x16xf32>
    %28 = math.exp %27 : vector<8x16xf32>
    %29 = arith.addf %19, %28 : vector<8x16xf32>
    %c2_i32 = arith.constant 2 : i32
    %30 = arith.index_cast %c2_i32 : i32 to index
    %c0_15 = arith.constant 0 : index
    %31 = vector.load %arg5[%30, %c0_15] : memref<8x256xf32, #tpu.memory_space<vmem>>, vector<1x256xf32>
    %32 = vector.broadcast %31 : vector<1x256xf32> to vector<8x256xf32>
    %33 = arith.subf %7, %32 : vector<8x256xf32>
    %34 = math.absf %33 : vector<8x256xf32>
    %cst_16 = arith.constant dense<0.000000e+00> : vector<8x16xf32>
    %35 = tpu.matmul %34, %8, %cst_16 {dimension_numbers = #tpu.dot_dimension_numbers<[1], [0], [0], [1], [0, 0, 1, 1], [], []>} : vector<8x256xf32>, vector<256x16xf32>, vector<8x16xf32> -> vector<8x16xf32>
    %cst_17 = arith.constant 0.000000e+00 : f32
    %36 = vector.broadcast %cst_17 : f32 to vector<8x16xf32>
    %37 = arith.subf %36, %35 : vector<8x16xf32>
    %38 = math.exp %37 : vector<8x16xf32>
    %39 = arith.addf %29, %38 : vector<8x16xf32>
    %c3_i32 = arith.constant 3 : i32
    %40 = arith.index_cast %c3_i32 : i32 to index
    %c0_18 = arith.constant 0 : index
    %41 = vector.load %arg5[%40, %c0_18] : memref<8x256xf32, #tpu.memory_space<vmem>>, vector<1x256xf32>
    %42 = vector.broadcast %41 : vector<1x256xf32> to vector<8x256xf32>
    %43 = arith.subf %7, %42 : vector<8x256xf32>
    %44 = math.absf %43 : vector<8x256xf32>
    %cst_19 = arith.constant dense<0.000000e+00> : vector<8x16xf32>
    %45 = tpu.matmul %44, %8, %cst_19 {dimension_numbers = #tpu.dot_dimension_numbers<[1], [0], [0], [1], [0, 0, 1, 1], [], []>} : vector<8x256xf32>, vector<256x16xf32>, vector<8x16xf32> -> vector<8x16xf32>
    %cst_20 = arith.constant 0.000000e+00 : f32
    %46 = vector.broadcast %cst_20 : f32 to vector<8x16xf32>
    %47 = arith.subf %46, %45 : vector<8x16xf32>
    %48 = math.exp %47 : vector<8x16xf32>
    %49 = arith.addf %39, %48 : vector<8x16xf32>
    %c4_i32 = arith.constant 4 : i32
    %50 = arith.index_cast %c4_i32 : i32 to index
    %c0_21 = arith.constant 0 : index
    %51 = vector.load %arg5[%50, %c0_21] : memref<8x256xf32, #tpu.memory_space<vmem>>, vector<1x256xf32>
    %52 = vector.broadcast %51 : vector<1x256xf32> to vector<8x256xf32>
    %53 = arith.subf %7, %52 : vector<8x256xf32>
    %54 = math.absf %53 : vector<8x256xf32>
    %cst_22 = arith.constant dense<0.000000e+00> : vector<8x16xf32>
    %55 = tpu.matmul %54, %8, %cst_22 {dimension_numbers = #tpu.dot_dimension_numbers<[1], [0], [0], [1], [0, 0, 1, 1], [], []>} : vector<8x256xf32>, vector<256x16xf32>, vector<8x16xf32> -> vector<8x16xf32>
    %cst_23 = arith.constant 0.000000e+00 : f32
    %56 = vector.broadcast %cst_23 : f32 to vector<8x16xf32>
    %57 = arith.subf %56, %55 : vector<8x16xf32>
    %58 = math.exp %57 : vector<8x16xf32>
    %59 = arith.addf %49, %58 : vector<8x16xf32>
    %c5_i32 = arith.constant 5 : i32
    %60 = arith.index_cast %c5_i32 : i32 to index
    %c0_24 = arith.constant 0 : index
    %61 = vector.load %arg5[%60, %c0_24] : memref<8x256xf32, #tpu.memory_space<vmem>>, vector<1x256xf32>
    %62 = vector.broadcast %61 : vector<1x256xf32> to vector<8x256xf32>
    %63 = arith.subf %7, %62 : vector<8x256xf32>
    %64 = math.absf %63 : vector<8x256xf32>
    %cst_25 = arith.constant dense<0.000000e+00> : vector<8x16xf32>
    %65 = tpu.matmul %64, %8, %cst_25 {dimension_numbers = #tpu.dot_dimension_numbers<[1], [0], [0], [1], [0, 0, 1, 1], [], []>} : vector<8x256xf32>, vector<256x16xf32>, vector<8x16xf32> -> vector<8x16xf32>
    %cst_26 = arith.constant 0.000000e+00 : f32
    %66 = vector.broadcast %cst_26 : f32 to vector<8x16xf32>
    %67 = arith.subf %66, %65 : vector<8x16xf32>
    %68 = math.exp %67 : vector<8x16xf32>
    %69 = arith.addf %59, %68 : vector<8x16xf32>
    %c6_i32 = arith.constant 6 : i32
    %70 = arith.index_cast %c6_i32 : i32 to index
    %c0_27 = arith.constant 0 : index
    %71 = vector.load %arg5[%70, %c0_27] : memref<8x256xf32, #tpu.memory_space<vmem>>, vector<1x256xf32>
    %72 = vector.broadcast %71 : vector<1x256xf32> to vector<8x256xf32>
    %73 = arith.subf %7, %72 : vector<8x256xf32>
    %74 = math.absf %73 : vector<8x256xf32>
    %cst_28 = arith.constant dense<0.000000e+00> : vector<8x16xf32>
    %75 = tpu.matmul %74, %8, %cst_28 {dimension_numbers = #tpu.dot_dimension_numbers<[1], [0], [0], [1], [0, 0, 1, 1], [], []>} : vector<8x256xf32>, vector<256x16xf32>, vector<8x16xf32> -> vector<8x16xf32>
    %cst_29 = arith.constant 0.000000e+00 : f32
    %76 = vector.broadcast %cst_29 : f32 to vector<8x16xf32>
    %77 = arith.subf %76, %75 : vector<8x16xf32>
    %78 = math.exp %77 : vector<8x16xf32>
    %79 = arith.addf %69, %78 : vector<8x16xf32>
    %c7_i32 = arith.constant 7 : i32
    %80 = arith.index_cast %c7_i32 : i32 to index
    %c0_30 = arith.constant 0 : index
    %81 = vector.load %arg5[%80, %c0_30] : memref<8x256xf32, #tpu.memory_space<vmem>>, vector<1x256xf32>
    %82 = vector.broadcast %81 : vector<1x256xf32> to vector<8x256xf32>
    %83 = arith.subf %7, %82 : vector<8x256xf32>
    %84 = math.absf %83 : vector<8x256xf32>
    %cst_31 = arith.constant dense<0.000000e+00> : vector<8x16xf32>
    %85 = tpu.matmul %84, %8, %cst_31 {dimension_numbers = #tpu.dot_dimension_numbers<[1], [0], [0], [1], [0, 0, 1, 1], [], []>} : vector<8x256xf32>, vector<256x16xf32>, vector<8x16xf32> -> vector<8x16xf32>
    %cst_32 = arith.constant 0.000000e+00 : f32
    %86 = vector.broadcast %cst_32 : f32 to vector<8x16xf32>
    %87 = arith.subf %86, %85 : vector<8x16xf32>
    %88 = math.exp %87 : vector<8x16xf32>
    %89 = arith.addf %79, %88 : vector<8x16xf32>
    %c8_i32_33 = arith.constant 8 : i32
    %cst_34 = arith.constant 1.000000e+00 : f32
    %90 = vector.broadcast %cst_34 : f32 to vector<8x16xf32>
    %91 = arith.subf %89, %90 : vector<8x16xf32>
    %c0_35 = arith.constant 0 : index
    %c0_36 = arith.constant 0 : index
    %92 = vector.load %arg4[%c0_35, %c0_36] : memref<8x16xf32, #tpu.memory_space<vmem>>, vector<8x16xf32>
    tpu.vector_store %arg4[%c0_35, %c0_36], %91 {strides = array<i32>} : memref<8x16xf32, #tpu.memory_space<vmem>>, vector<8x16xf32>,
    return
  }
  func.func @transform_0(%arg0: i32) -> (i32, i32) {
    %c0_i32 = arith.constant 0 : i32
    %c0_i32_0 = arith.constant 0 : i32
    %c0_i32_1 = arith.constant 0 : i32
    return %c0_i32, %c0_i32_0 : i32, i32
  }
  func.func @transform_1(%arg0: i32) -> (i32, i32) {
    %c0_i32 = arith.constant 0 : i32
    %c0_i32_0 = arith.constant 0 : i32
    %c0_i32_1 = arith.constant 0 : i32
    return %c0_i32, %c0_i32_0 : i32, i32
  }
  func.func @transform_2(%arg0: i32) -> (i32, i32) {
    %c0_i32 = arith.constant 0 : i32
    %c0_i32_0 = arith.constant 0 : i32
    %c0_i32_1 = arith.constant 0 : i32
    return %c0_i32, %c0_i32_0 : i32, i32
  }
  func.func @transform_3(%arg0: i32) -> (i32, i32) {
    %c0_i32 = arith.constant 0 : i32
    %c0_i32_0 = arith.constant 0 : i32
    return %arg0, %c0_i32 : i32, i32
  }
}

</mosaic_0001>

<bundles_post_ra>
// kernel: tpu_custom_call.1
= control target key start
LH: loop header
LB: loop body
LE: loop exit
PB: predicated region body
PF: predicated region fallthrough
CT: control target
= control target key end

     0   :  { %v1475_v7 = vmov 0.0   ;;  %vm24_vm0 = vcmask 261120   ;;  %s1868_s0 = inlined_call_operand.vmem [shape: f32[8,32], index: 0, kind: input, shape index: {}]   ;;  %s1869_s1 = inlined_call_operand.vmem [shape: f32[32,256], index: 1, kind: input, shape index: {}]   ;;  %s1870_s2 = inlined_call_operand.vmem [shape: f32[256,16], index: 2, kind: input, shape index: {}]   ;;  %s1871_s3 = inlined_call_operand.hbm [shape: f32[8,16], index: 3, kind: output, shape index: {}]  }
   0x1   :  { %v17_v0 = vld [vmem:[%s1869_s1 + $0x8] sm:$0xff]  ;;  %v19_v1 = vld [vmem:[%s1869_s1 + $0x18] sm:$0xff]  ;;  %v16_v2 = vld [vmem:[%s1869_s1] sm:$0xff]  ;;  %92 = vmatprep.mubr.f32.mxu0 %v1475_v7 }
   0x2   :  { %v1169_v3 = vpack.c.bf16 %v19_v1, %v17_v0  ;;  %v18_v4 = vld [vmem:[%s1869_s1 + $0x10] sm:$0xff]  ;;  %v21_v5 = vld [vmem:[%s1869_s1 + $0x28] sm:$0xff]  ;;  %v23_v6 = vld [vmem:[%s1869_s1 + $0x38] sm:$0xff] }
   0x3   :  { %v1171_v8 = vpack.c.bf16 %v18_v4, %v16_v2  ;;  %v1173_v9 = vpack.c.bf16 %v23_v6, %v21_v5  ;;  %v20_v10 = vld [vmem:[%s1869_s1 + $0x20] sm:$0xff]  ;;  %v22_v11 = vld [vmem:[%s1869_s1 + $0x30] sm:$0xff]  ;;  %v126_v13 = vld [vmem:[%s1870_s2 + $0x88] sm:$0xff] }
   0x4   :  { %1170 = vmatprep.subr.bf16.mxu0 %v1169_v3  ;;  %v125_v12 = vld [vmem:[%s1870_s2 + $0x80] sm:$0xff]  ;;  %v1175_v15 = vpack.c.bf16 %v22_v11, %v20_v10  ;;  %v110_v17 = vld [vmem:[%s1870_s2 + $0x8] sm:$0xff]  ;;  %v127_v18 = vld [vmem:[%s1870_s2 + $0x90] sm:$0xff] }
   0x5   :  { %v109_v14 = vld [vmem:[%s1870_s2] sm:$0xff]  ;;  %1172 = vmatpush1.bf16.msra.mxu0 %v1171_v8  ;;  %v1530_v16 = vpack.c.bf16 %v126_v13, %v125_v12  ;;  %v128_v19 = vld [vmem:[%s1870_s2 + $0x98] sm:$0xff]  ;;  %v111_v22 = vld [vmem:[%s1870_s2 + $0x10] sm:$0xff] }
   0x6   :  { %1174 = vmatprep.subr.bf16.mxu0 %v1173_v9  ;;  %v1541_v20 = vpack.c.bf16 %v110_v17, %v109_v14  ;;  %v1543_v21 = vpack.c.bf16 %v128_v19, %v127_v18  ;;  %v112_v23 = vld [vmem:[%s1870_s2 + $0x18] sm:$0xff]  ;;  %v129_v24 = vld [vmem:[%s1870_s2 + $0xa0] sm:$0xff]  ;;  %v130_v25 = vld [vmem:[%s1870_s2 + $0xa8] sm:$0xff] }
   0x7   :  { %1178 = vmatprep.subr.bf16.mxu1 %v1530_v16  ;;  %v15_v26 = vld [vmem:[%s1868_s0] sm:$0xff]  ;;  %v1562_v27 = vpack.c.bf16 %v112_v23, %v111_v22  ;;  %v1565_v28 = vpack.c.bf16 %v130_v25, %v129_v24  ;;  %v114_v30 = vld [vmem:[%s1870_s2 + $0x28] sm:$0xff] }
   0x8   :  { %1180 = vmatpush3.bf16.msra.mxu1 %v1541_v20  ;;  %v113_v29 = vld [vmem:[%s1870_s2 + $0x20] sm:$0xff] }
   0x9   :  { %1176 = vmatpush1.bf16.msra.mxu0 %v1175_v15  ;;  %1182 = vmatprep.subr.bf16.mxu1 %v1543_v21 }
   0xa   :  { %8 = vsyncpa [#allocation4], 0  ;;  %1210 = vmatprep.subr.bf16.mxu0 %v1530_v16  ;;  %v131_v31 = vld [vmem:[%s1870_s2 + $0xb0] sm:$0xff]  ;;  %v132_v32 = vld [vmem:[%s1870_s2 + $0xb8] sm:$0xff]  ;;  %v1581_v33 = vpack.c.bf16 %v114_v30, %v113_v29  ;;  %v143_v62 = vlaneseq  ;;  %vm869_vm1 = vcmask 130048  }
   0xb   :  { %v1585_v34 = vpack.c.bf16 %v132_v32, %v131_v31  ;;  %v115_v35 = vld [vmem:[%s1870_s2 + $0x30] sm:$0xff]  ;;  %v116_v36 = vld [vmem:[%s1870_s2 + $0x38] sm:$0xff]  ;;  %v133_v38 = vld [vmem:[%s1870_s2 + $0xc0] sm:$0xff] }
   0xc   :  { %887 = vmatmul.mubr.msk.f32.vlgmr.msra.gmra.mrb[0].mxu0 %vm24_vm0, %v15_v26  ;;  %1184 = vmatpush3.bf16.msra.mxu1 %v1562_v27  ;;  %v1595_v37 = vpack.c.bf16 %v116_v36, %v115_v35  ;;  %v134_v39 = vld [vmem:[%s1870_s2 + $0xc8] sm:$0xff]  ;;  %v117_v41 = vld [vmem:[%s1870_s2 + $0x40] sm:$0xff]  ;;  %v135_v44 = vld [vmem:[%s1870_s2 + $0xd0] sm:$0xff]  ;;  %v144_v1 = vshrl.u32 %v143_v62, 7 }
   0xd   :  { %1212 = vmatpush3.bf16.msra.mxu0 %v1541_v20  ;;  %1186 = vmatprep.subr.bf16.mxu1 %v1565_v28  ;;  %v1610_v40 = vpack.c.bf16 %v134_v39, %v133_v38  ;;  %v118_v42 = vld [vmem:[%s1870_s2 + $0x48] sm:$0xff]  ;;  %v136_v45 = vld [vmem:[%s1870_s2 + $0xd8] sm:$0xff]  ;;  %v119_v47 = vld [vmem:[%s1870_s2 + $0x50] sm:$0xff] }
   0xe   :  { %1214 = vmatprep.subr.bf16.mxu0 %v1543_v21  ;;  %v1618_v43 = vpack.c.bf16 %v118_v42, %v117_v41  ;;  %v1630_v46 = vpack.c.bf16 %v136_v45, %v135_v44  ;;  %v120_v48 = vld [vmem:[%s1870_s2 + $0x58] sm:$0xff]  ;;  %v137_v49 = vld [vmem:[%s1870_s2 + $0xe0] sm:$0xff]  ;;  %v138_v51 = vld [vmem:[%s1870_s2 + $0xe8] sm:$0xff]  ;;  %v1692_v2 = vsub.s32 0, %v144_v1  ;;  %v1694_v3 = vsub.s32 1, %v144_v1 }
   0xf   :  { %v1641_v50 = vpack.c.bf16 %v120_v48, %v119_v47  ;;  %v121_v52 = vld [vmem:[%s1870_s2 + $0x60] sm:$0xff]  ;;  %v122_v53 = vld [vmem:[%s1870_s2 + $0x68] sm:$0xff]  ;;  %v1654_v54 = vpack.c.bf16 %v138_v51, %v137_v49  ;;  %v139_v55 = vld [vmem:[%s1870_s2 + $0xf0] sm:$0xff] }
  0x10   :  { %1188 = vmatpush3.bf16.msra.mxu1 %v1581_v33  ;;  %v140_v56 = vld [vmem:[%s1870_s2 + $0xf8] sm:$0xff]  ;;  %v1664_v57 = vpack.c.bf16 %v122_v53, %v121_v52  ;;  %v123_v59 = vld [vmem:[%s1870_s2 + $0x70] sm:$0xff] }
  0x11   :  { %1216 = vmatpush3.bf16.msra.mxu0 %v1562_v27  ;;  %1190 = vmatprep.subr.bf16.mxu1 %v1585_v34  ;;  %v1668_v58 = vpack.c.bf16 %v140_v56, %v139_v55  ;;  %v124_v60 = vld [vmem:[%s1870_s2 + $0x78] sm:$0xff]  ;;  %s1476_s2 = smov [#allocation3]  }
  0x12   :  { %1218 = vmatprep.subr.bf16.mxu0 %v1565_v28  ;;  %v1678_v61 = vpack.c.bf16 %v124_v60, %v123_v59  ;;  %s877_s1 = sshll.u32 %s1476_s2, 4  ;;  %s878_s1 = int_to_ptr.vmem [resolvable:$true] %s877_s1 }
  0x13   :  { %s1451_s9 = scalar_lea.vmem %s878_s1, 128  ;;  %p1456_p1 = scmp.lt.s32.totalorder %s878_s1, %s878_s1 }
  0x14   :  { %1192 = vmatpush3.bf16.msra.mxu1 %v1595_v37  ;;  %p1452_p0 = scmp.ne.s32.totalorder %s878_s1, %s1451_s9  ;;  %p1457_p2 = scmp.lt.s32.totalorder %s1451_s9, %s1451_s9 }
  0x15   :  { %1220 = vmatpush3.bf16.msra.mxu0 %v1581_v33  ;;  %1194 = vmatprep.subr.bf16.mxu1 %v1610_v40 }
  0x16   :  { %1222 = vmatprep.subr.bf16.mxu0 %v1585_v34  ;;  %p1458_p3 = por %p1457_p2, %p1456_p1 }
  0x18   :  { %1196 = vmatpush3.bf16.msra.mxu1 %v1618_v43  ;;  %p1459_p4 = pnand %p1458_p3, %p1452_p0 }
  0x19   :  { %1224 = vmatpush3.bf16.msra.mxu0 %v1595_v37  ;;  %1198 = vmatprep.subr.bf16.mxu1 %v1630_v46 }
  0x1a   :  { %1226 = vmatprep.subr.bf16.mxu0 %v1610_v40 }
  0x1c   :  { %1200 = vmatpush3.bf16.msra.mxu1 %v1641_v50 }
  0x1d   :  { %1228 = vmatpush3.bf16.msra.mxu0 %v1618_v43  ;;  %1202 = vmatprep.subr.bf16.mxu1 %v1654_v54 }
  0x1e   :  { %1230 = vmatprep.subr.bf16.mxu0 %v1630_v46 }
  0x20   :  { %1204 = vmatpush3.bf16.msra.mxu1 %v1664_v57 }
  0x21   :  { %1232 = vmatpush3.bf16.msra.mxu0 %v1641_v50  ;;  %1206 = vmatprep.subr.bf16.mxu1 %v1668_v58 }
  0x22   :  { %1234 = vmatprep.subr.bf16.mxu0 %v1654_v54 }
  0x24   :  { %1208 = vmatpush3.bf16.msra.mxu1 %v1678_v61 }
  0x25   :  { %1236 = vmatpush3.bf16.msra.mxu0 %v1664_v57  ;;  %1242 = vmatprep.subr.bf16.mxu1 %v1530_v16 }
  0x26   :  { %1238 = vmatprep.subr.bf16.mxu0 %v1668_v58 }
  0x29   :  { %1240 = vmatpush3.bf16.msra.mxu0 %v1678_v61 }
  0x2a   :  { %1274 = vmatprep.subr.bf16.mxu0 %v1530_v16 }
  0xdf   :  { %v1686_v63 = vpop.f32.mrb[0].mxu0 }
  0xe0   :  { %99 = vst [vmem:[#allocation2] sm:$0xff] %v1686_v63  ;;  %v1689_v0 = vpop.f32.mrb[1].mxu0 }
  0xe1   :  { %100 = vst [vmem:[#allocation2 + $0x8] sm:$0xff] %v1689_v0 }
  0xe8   :  { %v141_v4 = vld [vmem:[#allocation2] ss:$8 sm:$0x3]  ;;  %v232_v5 = vld [vmem:[#allocation2 + $0x1] ss:$8 sm:$0x3] }
  0xe9   :  { %v146_v6 = vrot.slane %v141_v4, %v1692_v2  ;;  %v150_v7 = vrot.slane %v141_v4, %v1694_v3  ;;  %v237_v8 = vrot.slane %v232_v5, %v1692_v2  ;;  %v241_v9 = vrot.slane %v232_v5, %v1694_v3  ;;  %v1700_v10 = vld [vmem:[#allocation2 + $0x2] ss:$8 sm:$0x3]  ;;  %v1702_v11 = vld [vmem:[#allocation2 + $0x3] ss:$8 sm:$0x3] }
  0xea   :  { %v332_v12 = vrot.slane %v1700_v10, %v1694_v3  ;;  %v423_v13 = vrot.slane %v1702_v11, %v1694_v3  ;;  %v1708_v14 = vld [vmem:[#allocation2 + $0x4] ss:$8 sm:$0x3]  ;;  %v1716_v24 = vld [vmem:[#allocation2 + $0x5] ss:$8 sm:$0x3]  ;;  %v328_v55 = vrot.slane %v1700_v10, %v1692_v2  ;;  %v419_v56 = vrot.slane %v1702_v11, %v1692_v2 }
  0xeb   :  { %v154_v15 = vsub.f32 %v1689_v0, %v150_v7  ;;  %v245_v17 = vsub.f32 %v1689_v0, %v241_v9  ;;  %v153_v18 = vsub.f32 %v1686_v63, %v146_v6  ;;  %v244_v19 = vsub.f32 %v1686_v63, %v237_v8  ;;  %v687_v25 = vld [vmem:[#allocation2 + $0x6] ss:$8 sm:$0x3]  ;;  %v778_v36 = vld [vmem:[#allocation2 + $0x7] ss:$8 sm:$0x3] }
  0xec   :  { %v336_v22 = vsub.f32 %v1689_v0, %v332_v12  ;;  %v427_v23 = vsub.f32 %v1689_v0, %v423_v13  ;;  %v510_v31 = vrot.slane %v1708_v14, %v1692_v2  ;;  %v601_v35 = vrot.slane %v1716_v24, %v1692_v2 }
  0xed   :  { %v156_v26 = vand.u32 2147483647, %v154_v15  ;;  %v247_v29 = vand.u32 2147483647, %v245_v17  ;;  %v155_v30 = vand.u32 2147483647, %v153_v18  ;;  %v692_v42 = vrot.slane %v687_v25, %v1692_v2 }
  0xee   :  { %v246_v32 = vand.u32 2147483647, %v244_v19  ;;  %v338_v38 = vand.u32 2147483647, %v336_v22  ;;  %v429_v39 = vand.u32 2147483647, %v427_v23  ;;  %v1723_v41 = vsub.f32 %v1686_v63, %v510_v31 }
  0xef   :  { %221 = vmatprep.mubr.f32.mxu1 %v156_v26  ;;  %312 = vmatprep.mubr.f32.mxu0 %v247_v29  ;;  %v1729_v44 = vsub.f32 %v1686_v63, %v601_v35  ;;  %v696_v45 = vrot.slane %v687_v25, %v1694_v3  ;;  %v783_v47 = vrot.slane %v778_v36, %v1692_v2 }
  0xf0   :  { %222 = vmatmul.mubr.f32.vlgmr.msra.gmra.mrb[0].mxu1 %v155_v30  ;;  %313 = vmatmul.mubr.f32.vlgmr.msra.gmra.mrb[2].mxu0 %v246_v32  ;;  %v787_v48 = vrot.slane %v778_v36, %v1694_v3  ;;  %v1740_v51 = vsub.f32 %v1686_v63, %v692_v42  ;;  %v514_v59 = vrot.slane %v1708_v14, %v1694_v3 }
  0xf1   :  { %1244 = vmatpush3.bf16.msra.mxu1 %v1541_v20  ;;  %1276 = vmatpush3.bf16.msra.mxu0 %v1541_v20  ;;  %v1737_v49 = vsub.f32 %v1689_v0, %v696_v45  ;;  %v1746_v53 = vsub.f32 %v1686_v63, %v783_v47  ;;  %v605_v60 = vrot.slane %v1716_v24, %v1694_v3 }
  0xf2   :  { %403 = vmatprep.mubr.f32.mxu1 %v338_v38  ;;  %494 = vmatprep.mubr.f32.mxu0 %v429_v39  ;;  %v1743_v52 = vsub.f32 %v1689_v0, %v787_v48  ;;  %v335_v62 = vsub.f32 %v1686_v63, %v328_v55  ;;  %v426_v1 = vsub.f32 %v1686_v63, %v419_v56  ;;  %v519_v63 = vand.u32 2147483647, %v1723_v41 }
  0xf3   :  { %1246 = vmatprep.subr.bf16.mxu1 %v1543_v21  ;;  %1278 = vmatprep.subr.bf16.mxu0 %v1543_v21  ;;  %v518_v2 = vsub.f32 %v1689_v0, %v514_v59  ;;  %v609_v4 = vsub.f32 %v1689_v0, %v605_v60  ;;  %v610_v0 = vand.u32 2147483647, %v1729_v44  ;;  %v702_v8 = vand.u32 2147483647, %v1737_v49 }
  0xf4   :  { %v337_v3 = vand.u32 2147483647, %v335_v62  ;;  %v428_v5 = vand.u32 2147483647, %v426_v1  ;;  %v793_v9 = vand.u32 2147483647, %v1743_v52 }
  0xf5   :  { %1248 = vmatpush3.bf16.msra.mxu1 %v1562_v27  ;;  %1280 = vmatpush3.bf16.msra.mxu0 %v1562_v27  ;;  %v520_v6 = vand.u32 2147483647, %v518_v2  ;;  %v611_v7 = vand.u32 2147483647, %v609_v4 }
  0xf6   :  { %1250 = vmatprep.subr.bf16.mxu1 %v1565_v28  ;;  %1282 = vmatprep.subr.bf16.mxu0 %v1565_v28 }
  0xf9   :  { %1252 = vmatpush3.bf16.msra.mxu1 %v1581_v33  ;;  %1284 = vmatpush3.bf16.msra.mxu0 %v1581_v33 }
  0xfa   :  { %1254 = vmatprep.subr.bf16.mxu1 %v1585_v34  ;;  %1286 = vmatprep.subr.bf16.mxu0 %v1585_v34 }
  0xfd   :  { %1256 = vmatpush3.bf16.msra.mxu1 %v1595_v37  ;;  %1288 = vmatpush3.bf16.msra.mxu0 %v1595_v37 }
  0xfe   :  { %1258 = vmatprep.subr.bf16.mxu1 %v1610_v40  ;;  %1290 = vmatprep.subr.bf16.mxu0 %v1610_v40 }
 0x101   :  { %1260 = vmatpush3.bf16.msra.mxu1 %v1618_v43  ;;  %1292 = vmatpush3.bf16.msra.mxu0 %v1618_v43 }
 0x102   :  { %1262 = vmatprep.subr.bf16.mxu1 %v1630_v46  ;;  %1294 = vmatprep.subr.bf16.mxu0 %v1630_v46 }
 0x105   :  { %1264 = vmatpush3.bf16.msra.mxu1 %v1641_v50  ;;  %1296 = vmatpush3.bf16.msra.mxu0 %v1641_v50 }
 0x106   :  { %1266 = vmatprep.subr.bf16.mxu1 %v1654_v54  ;;  %1298 = vmatprep.subr.bf16.mxu0 %v1654_v54 }
 0x109   :  { %1268 = vmatpush3.bf16.msra.mxu1 %v1664_v57  ;;  %1300 = vmatpush3.bf16.msra.mxu0 %v1664_v57 }
 0x10a   :  { %1270 = vmatprep.subr.bf16.mxu1 %v1668_v58  ;;  %1302 = vmatprep.subr.bf16.mxu0 %v1668_v58 }
 0x10d   :  { %1272 = vmatpush3.bf16.msra.mxu1 %v1678_v61  ;;  %1304 = vmatpush3.bf16.msra.mxu0 %v1678_v61 }
 0x10e   :  { %1306 = vmatprep.subr.bf16.mxu1 %v1530_v16  ;;  %1338 = vmatprep.subr.bf16.mxu0 %v1530_v16 }
 0x110   :  { %404 = vmatmul.mubr.f32.vlgmr.msra.gmra.mrb[2].mxu1 %v337_v3  ;;  %495 = vmatmul.mubr.f32.vlgmr.msra.gmra.mrb[4].mxu0 %v428_v5 }
 0x111   :  { %1308 = vmatpush3.bf16.msra.mxu1 %v1541_v20  ;;  %585 = vmatprep.mubr.f32.mxu1 %v520_v6 }
 0x112   :  { %1340 = vmatpush3.bf16.msra.mxu0 %v1541_v20  ;;  %676 = vmatprep.mubr.f32.mxu0 %v611_v7 }
 0x113   :  { %1310 = vmatprep.subr.bf16.mxu1 %v1543_v21  ;;  %1342 = vmatprep.subr.bf16.mxu0 %v1543_v21 }
 0x115   :  { %1312 = vmatpush3.bf16.msra.mxu1 %v1562_v27 }
 0x116   :  { %1344 = vmatpush3.bf16.msra.mxu0 %v1562_v27  ;;  %1314 = vmatprep.subr.bf16.mxu1 %v1565_v28 }
 0x117   :  { %1346 = vmatprep.subr.bf16.mxu0 %v1565_v28 }
 0x119   :  { %1316 = vmatpush3.bf16.msra.mxu1 %v1581_v33 }
 0x11a   :  { %1348 = vmatpush3.bf16.msra.mxu0 %v1581_v33  ;;  %1318 = vmatprep.subr.bf16.mxu1 %v1585_v34 }
 0x11b   :  { %1350 = vmatprep.subr.bf16.mxu0 %v1585_v34 }
 0x11d   :  { %1320 = vmatpush3.bf16.msra.mxu1 %v1595_v37 }
 0x11e   :  { %1352 = vmatpush3.bf16.msra.mxu0 %v1595_v37  ;;  %1322 = vmatprep.subr.bf16.mxu1 %v1610_v40 }
 0x11f   :  { %1354 = vmatprep.subr.bf16.mxu0 %v1610_v40 }
 0x121   :  { %1324 = vmatpush3.bf16.msra.mxu1 %v1618_v43 }
 0x122   :  { %1356 = vmatpush3.bf16.msra.mxu0 %v1618_v43  ;;  %1326 = vmatprep.subr.bf16.mxu1 %v1630_v46 }
 0x123   :  { %1358 = vmatprep.subr.bf16.mxu0 %v1630_v46 }
 0x125   :  { %1328 = vmatpush3.bf16.msra.mxu1 %v1641_v50 }
 0x126   :  { %1360 = vmatpush3.bf16.msra.mxu0 %v1641_v50  ;;  %1330 = vmatprep.subr.bf16.mxu1 %v1654_v54 }
 0x127   :  { %1362 = vmatprep.subr.bf16.mxu0 %v1654_v54 }
 0x129   :  { %1332 = vmatpush3.bf16.msra.mxu1 %v1664_v57 }
 0x12a   :  { %1364 = vmatpush3.bf16.msra.mxu0 %v1664_v57  ;;  %1334 = vmatprep.subr.bf16.mxu1 %v1668_v58 }
 0x12b   :  { %1366 = vmatprep.subr.bf16.mxu0 %v1668_v58 }
 0x12d   :  { %1336 = vmatpush3.bf16.msra.mxu1 %v1678_v61 }
 0x12e   :  { %1368 = vmatpush3.bf16.msra.mxu0 %v1678_v61  ;;  %1370 = vmatprep.subr.bf16.mxu1 %v1530_v16 }
 0x12f   :  { %1402 = vmatprep.subr.bf16.mxu0 %v1530_v16  ;;  %v701_v16 = vand.u32 2147483647, %v1740_v51 }
 0x130   :  { %586 = vmatmul.mubr.f32.vlgmr.msra.gmra.mrb[4].mxu1 %v519_v63 }
 0x131   :  { %677 = vmatmul.mubr.f32.vlgmr.msra.gmra.mrb[6].mxu0 %v610_v0  ;;  %1372 = vmatpush3.bf16.msra.mxu1 %v1541_v20 }
 0x132   :  { %767 = vmatprep.mubr.f32.mxu1 %v702_v8  ;;  %1404 = vmatpush3.bf16.msra.mxu0 %v1541_v20  ;;  %v792_v20 = vand.u32 2147483647, %v1746_v53 }
 0x133   :  { %858 = vmatprep.mubr.f32.mxu0 %v793_v9  ;;  %1374 = vmatprep.subr.bf16.mxu1 %v1543_v21 }
 0x134   :  { %1406 = vmatprep.subr.bf16.mxu0 %v1543_v21 }
 0x135   :  { %1376 = vmatpush3.bf16.msra.mxu1 %v1562_v27 }
 0x136   :  { %1408 = vmatpush3.bf16.msra.mxu0 %v1562_v27  ;;  %1378 = vmatprep.subr.bf16.mxu1 %v1565_v28 }
 0x137   :  { %1410 = vmatprep.subr.bf16.mxu0 %v1565_v28 }
 0x139   :  { %1380 = vmatpush3.bf16.msra.mxu1 %v1581_v33 }
 0x13a   :  { %1412 = vmatpush3.bf16.msra.mxu0 %v1581_v33  ;;  %1382 = vmatprep.subr.bf16.mxu1 %v1585_v34 }
 0x13b   :  { %1414 = vmatprep.subr.bf16.mxu0 %v1585_v34 }
 0x13d   :  { %1384 = vmatpush3.bf16.msra.mxu1 %v1595_v37 }
 0x13e   :  { %1416 = vmatpush3.bf16.msra.mxu0 %v1595_v37  ;;  %1386 = vmatprep.subr.bf16.mxu1 %v1610_v40 }
 0x13f   :  { %1418 = vmatprep.subr.bf16.mxu0 %v1610_v40 }
 0x141   :  { %1388 = vmatpush3.bf16.msra.mxu1 %v1618_v43 }
 0x142   :  { %1420 = vmatpush3.bf16.msra.mxu0 %v1618_v43  ;;  %1390 = vmatprep.subr.bf16.mxu1 %v1630_v46 }
 0x143   :  { %1422 = vmatprep.subr.bf16.mxu0 %v1630_v46 }
 0x145   :  { %1392 = vmatpush3.bf16.msra.mxu1 %v1641_v50 }
 0x146   :  { %1424 = vmatpush3.bf16.msra.mxu0 %v1641_v50  ;;  %1394 = vmatprep.subr.bf16.mxu1 %v1654_v54 }
 0x147   :  { %1426 = vmatprep.subr.bf16.mxu0 %v1654_v54 }
 0x149   :  { %1396 = vmatpush3.bf16.msra.mxu1 %v1664_v57 }
 0x14a   :  { %1428 = vmatpush3.bf16.msra.mxu0 %v1664_v57  ;;  %1398 = vmatprep.subr.bf16.mxu1 %v1668_v58 }
 0x14b   :  { %1430 = vmatprep.subr.bf16.mxu0 %v1668_v58 }
 0x14d   :  { %1400 = vmatpush3.bf16.msra.mxu1 %v1678_v61 }
 0x14e   :  { %1432 = vmatpush3.bf16.msra.mxu0 %v1678_v61 }
 0x150   :  { %768 = vmatmul.mubr.f32.vlgmr.msra.gmra.mrb[6].mxu1 %v701_v16 }
 0x151   :  { %859 = vmatmul.mubr.f32.vlgmr.msra.gmra.mrb[8].mxu0 %v792_v20 }
 0x1c3   :  { %v921_v21 = vpop.f32.mrb[0].mxu1  ;;  %v956_v27 = vpop.f32.mrb[2].mxu0 }
 0x1c4   :  { %v922_v28 = vpop.f32.mrb[1].mxu1  ;;  %v957_v33 = vpop.f32.mrb[3].mxu0 }
 0x1c5   :  { %v923_v34 = vadd.f32 %v922_v28, %v921_v21  ;;  %v958_v37 = vadd.f32 %v957_v33, %v956_v27 }
 0x1c7   :  { %v227_v40 = vsub.f32 0.0, %v923_v34  ;;  %v318_v43 = vsub.f32 0.0, %v958_v37 }
 0x1c9   :  { %v228_v46 = vmul.f32 1.442695, %v227_v40  ;;  %v319_v50 = vmul.f32 1.442695, %v318_v43 }
 0x1cb   :  { %1435 = vpow2.f32 %v228_v46 }
 0x1cc   :  { %1437 = vpow2.f32 %v319_v50 }
 0x1d5   :  { %v1436_v54 = vpop.eup %1435 }
 0x1d6   :  { %v1438_v57 = vpop.eup %1437 }
 0x1d7   :  { %v321_v58 = vadd.f32 %v1438_v57, %v1436_v54 }
 0x1e3   :  { %v991_v61 = vpop.f32.mrb[2].mxu1  ;;  %v1026_v10 = vpop.f32.mrb[4].mxu0 }
 0x1e4   :  { %v992_v11 = vpop.f32.mrb[3].mxu1  ;;  %v1027_v12 = vpop.f32.mrb[5].mxu0 }
 0x1e5   :  { %v993_v13 = vadd.f32 %v992_v11, %v991_v61  ;;  %v1028_v14 = vadd.f32 %v1027_v12, %v1026_v10 }
 0x1e7   :  { %v409_v15 = vsub.f32 0.0, %v993_v13  ;;  %v500_v17 = vsub.f32 0.0, %v1028_v14 }
 0x1e9   :  { %v410_v18 = vmul.f32 1.442695, %v409_v15  ;;  %v501_v19 = vmul.f32 1.442695, %v500_v17 }
 0x1eb   :  { %1439 = vpow2.f32 %v410_v18 }
 0x1ec   :  { %1441 = vpow2.f32 %v501_v19 }
 0x1f5   :  { %v1440_v22 = vpop.eup %1439 }
 0x1f6   :  { %v412_v23 = vadd.f32 %v1440_v22, %v321_v58  ;;  %v1442_v24 = vpop.eup %1441 }
 0x1f8   :  { %v503_v25 = vadd.f32 %v1442_v24, %v412_v23 }
 0x203   :  { %v1061_v26 = vpop.f32.mrb[4].mxu1 }
 0x204   :  { %v1096_v29 = vpop.f32.mrb[6].mxu0  ;;  %v1062_v30 = vpop.f32.mrb[5].mxu1 }
 0x205   :  { %v1063_v31 = vadd.f32 %v1062_v30, %v1061_v26  ;;  %v1097_v32 = vpop.f32.mrb[7].mxu0 }
 0x206   :  { %v1098_v35 = vadd.f32 %v1097_v32, %v1096_v29 }
 0x207   :  { %v591_v36 = vsub.f32 0.0, %v1063_v31 }
 0x208   :  { %v682_v38 = vsub.f32 0.0, %v1098_v35 }
 0x209   :  { %v592_v39 = vmul.f32 1.442695, %v591_v36 }
 0x20a   :  { %v683_v41 = vmul.f32 1.442695, %v682_v38 }
 0x20b   :  { %1443 = vpow2.f32 %v592_v39 }
 0x20c   :  { %1445 = vpow2.f32 %v683_v41 }
 0x215   :  { %v1444_v42 = vpop.eup %1443 }
 0x216   :  { %v594_v44 = vadd.f32 %v1444_v42, %v503_v25  ;;  %v1446_v45 = vpop.eup %1445 }
 0x218   :  { %v685_v47 = vadd.f32 %v1446_v45, %v594_v44 }
 0x223   :  { %v1131_v48 = vpop.f32.mrb[6].mxu1 }
 0x224   :  { %v1166_v49 = vpop.f32.mrb[8].mxu0  ;;  %v1132_v51 = vpop.f32.mrb[7].mxu1 }
 0x225   :  { %v1133_v52 = vadd.f32 %v1132_v51, %v1131_v48  ;;  %v1167_v53 = vpop.f32.mrb[9].mxu0 }
 0x226   :  { %v1168_v55 = vadd.f32 %v1167_v53, %v1166_v49 }
 0x227   :  { %v773_v56 = vsub.f32 0.0, %v1133_v52 }
 0x228   :  { %v864_v59 = vsub.f32 0.0, %v1168_v55 }
 0x229   :  { %v774_v60 = vmul.f32 1.442695, %v773_v56 }
 0x22a   :  { %v865_v62 = vmul.f32 1.442695, %v864_v59 }
 0x22b   :  { %1447 = vpow2.f32 %v774_v60 }
 0x22c   :  { %1449 = vpow2.f32 %v865_v62 }
 0x235   :  { %v1448_v1 = vpop.eup %1447 }
 0x236   :  { %v776_v2 = vadd.f32 %v1448_v1, %v685_v47  ;;  %v1450_v4 = vpop.eup %1449 }
 0x238   :  { %v867_v3 = vadd.f32 %v1450_v4, %v776_v2 }
 0x23a   :  { %v888_v5 = vadd.f32 -1.0, %v867_v3 }
 0x23c   :  { %870 = vst.msk [vmem:[#allocation3] sm:$0xff] %vm869_vm1, %v888_v5 }
 0x23d   :  { %1462 = shalt.err (!%p1459_p4)
}
 0x23e   :  { %s1463_s12 = scalar_lea.hbm %s1871_s3, 128 }
 0x23f   :  { %p1464_p5 = scmp.ne.s32.totalorder %s1871_s3, %s1463_s12  ;;  %p1467_p6 = scmp.lt.u32.totalorder %s1463_s12, %s1871_s3 }
 0x241   :  { %p1469_p7 = pnand %p1467_p6, %p1464_p5 }
 0x243   :  { %1472 = shalt.err (!%p1469_p7)
}
 0x244   :  { %880 = dma.vmem_to_hbm [thread:$0]  %s878_s1, 128, %s1871_s3, [#allocation4]  }
 0x245   :  { %1473 = dma.done.wait [#allocation4], 128  }
 0x246   :  { %1474 = vsyncadd [#allocation4], 4294967168 }
 0x247   :  { %884 = vsyncpa [#allocation4], 1 }

</bundles_post_ra>
